<compile_context>
chip_gen: v6e
topology: v6e:2x2x1
jax: 0.10.0
libtpu: 0.0.40
codegen_flags: <defaults>
</compile_context>

<pallas_src>
import numpy as np
import jax
import jax.numpy as jnp
from jax.experimental import pallas as pl
from jax.experimental.pallas import tpu as pltpu


# ----------------------------------------------------------------------------
# Helpers
# ----------------------------------------------------------------------------
def _round_up(x, m):
    return ((x + m - 1) // m) * m


def _hann_periodic(n):
    k = np.arange(n)
    return 0.5 - 0.5 * np.cos(2.0 * np.pi * k / n)


def make_packed_stft_basis(filter_length, win_length, pack):
    """(pack, pack) block-diagonal STFT basis.

    A packed input row is [frame0 (FL) | frame1 | ...] with pf = pack // FL frames.
    Output columns are arranged as [real(f0), real(f1), ... | imag(f0), imag(f1), ...]
    so columns [0:pack/2) are real and column j pairs with column pack/2 + j,
    regardless of FL.  Nyquist bin is dropped (matches spect[:, :-1, :]).
    """
    half = filter_length // 2
    fourier = np.fft.fft(np.eye(filter_length))
    real = np.real(fourier[:half, :])
    imag = np.imag(fourier[:half, :])
    win = _hann_periodic(win_length)
    lpad = (filter_length - win_length) // 2
    win = np.pad(win, (lpad, filter_length - win_length - lpad))
    base = np.concatenate([real * win[None, :], imag * win[None, :]], axis=0).T  # (FL, FL)

    pf = pack // filter_length
    ph = pack // 2
    packed = np.zeros((pack, pack), dtype=np.float64)
    for f in range(pf):
        rows = slice(f * filter_length, (f + 1) * filter_length)
        packed[rows, f * half:(f + 1) * half] = base[:, :half]                    # real
        packed[rows, ph + f * half: ph + (f + 1) * half] = base[:, half:]         # imag
    return packed.astype(np.float32)


def _frames_to_rows(audio, fl, hop, kept, pack, dtype):
    """Frame reflect-padded audio and lane-pack pack//fl frames per row of width pack.

    Frames come out in residue-major order; ordering is irrelevant for the L1 sum since
    pred and gt use the identical ordering.  Output is cast to `dtype` (bf16) so all
    downstream XLA prep copies are half-width too.
    """
    B, _ = audio.shape
    pad = fl // 2
    padded = jnp.pad(audio, ((0, 0), (pad, pad)), mode="reflect").astype(dtype)
    if fl % hop == 0:
        r = fl // hop
        slabs = []
        for s in range(r):
            n_s = (kept - s + r - 1) // r
            if n_s > 0:
                sl = jax.lax.slice_in_dim(padded, s * hop, s * hop + n_s * fl, axis=1)
                slabs.append(sl.reshape(B, n_s, fl))
        frames = jnp.concatenate(slabs, axis=1)                      # (B, kept, fl)
    else:
        # TODO(synk): hop does not divide filter_length -> gather fallback (slow, untested).
        idx = jnp.arange(kept)[:, None] * hop + jnp.arange(fl)[None, :]
        frames = padded[:, idx]

    pf = pack // fl
    kept_p = _round_up(kept, pf)
    if kept_p != kept:
        frames = jnp.pad(frames, ((0, 0), (0, kept_p - kept), (0, 0)))
    return frames.reshape(B * (kept_p // pf), pack)                  # (rows, pack)


# ----------------------------------------------------------------------------
# Pallas kernels
# ----------------------------------------------------------------------------
def _spect_l1_kernel(res_ids_ref, pred_ref, gt_ref, basis_ref, out_ref):
    """Fused multi-res STFT -> log-magnitude -> |pred-gt| partial-sum accumulator."""
    del res_ids_ref  # only used by the index_maps (basis selection)

    @pl.when(pl.program_id(1) == 0)
    def _init():
        out_ref[...] = jnp.zeros_like(out_ref)

    basis = basis_ref[0]                                # (PACK, PACK) bf16
    sp = jnp.dot(pred_ref[0], basis, preferred_element_type=jnp.float32)
    sg = jnp.dot(gt_ref[0], basis, preferred_element_type=jnp.float32)
    half = sp.shape[1] // 2                             # lane-dense: PACK//2 = 128
    p2 = jnp.maximum(sp[:, :half] * sp[:, :half] + sp[:, half:] * sp[:, half:], 1e-10)
    g2 = jnp.maximum(sg[:, :half] * sg[:, :half] + sg[:, half:] * sg[:, half:], 1e-10)
    # |log(max(|p|,1e-5)) - log(max(|g|,1e-5))| == 0.5*|log(max(p2,1e-10)/max(g2,1e-10))|
    # -> single EUP log per bin; padded rows give p2 == g2 == 1e-10 -> exactly 0.
    diff = 0.5 * jnp.abs(jnp.log(p2 / g2))              # (tile, 128) f32
    out_ref[...] += diff[None, :, :]                    # lane-dense VMEM-resident accumulator


def _audio_l1_kernel(p_ref, g_ref, out_ref):
    @pl.when(pl.program_id(0) == 0)
    def _init():
        out_ref[...] = jnp.zeros_like(out_ref)
    out_ref[...] += jnp.abs(p_ref[...] - g_ref[...])


# ----------------------------------------------------------------------------
# pallas_call wrappers
# ----------------------------------------------------------------------------
def _spect_l1_partial(res_ids, pred_all, gt_all, bases, *, splits, tiles_per_split,
                      tile, pack):
    tps = tiles_per_split
    return pl.pallas_call(
        _spect_l1_kernel,
        out_shape=jax.ShapeDtypeStruct((splits, tile, pack // 2), jnp.float32),
        grid_spec=pltpu.PrefetchScalarGridSpec(
            num_scalar_prefetch=1,
            grid=(splits, tps),
            in_specs=[
                pl.BlockSpec((1, tile, pack),
                             lambda c, j, ids: (c * tps + j, 0, 0)),
                pl.BlockSpec((1, tile, pack),
                             lambda c, j, ids: (c * tps + j, 0, 0)),
                pl.BlockSpec((1, pack, pack),
                             lambda c, j, ids: (ids[c * tps + j], 0, 0)),
            ],
            out_specs=pl.BlockSpec((1, tile, pack // 2),
                                   lambda c, j, ids: (c, 0, 0)),
        ),
        compiler_params=pltpu.CompilerParams(
            dimension_semantics=("parallel", "arbitrary")),
    )(res_ids, pred_all, gt_all, bases)


def _audio_l1_partial(pred_audio, gt_audio, *, cols=512, max_tile_rows=256):
    n = pred_audio.shape[0] * pred_audio.shape[1]
    rows = _round_up(n, cols) // cols
    tile = min(max_tile_rows, _round_up(rows, 8))
    rows_p = _round_up(rows, tile)

    def prep(a):
        a = a.reshape(-1)
        a = jnp.pad(a, (0, rows_p * cols - n))
        return a.reshape(rows_p, cols)

    p, g = prep(pred_audio), prep(gt_audio)
    return pl.pallas_call(
        _audio_l1_kernel,
        out_shape=jax.ShapeDtypeStruct((tile, cols), jnp.float32),
        grid_spec=pltpu.PrefetchScalarGridSpec(
            num_scalar_prefetch=0,
            grid=(rows_p // tile,),
            in_specs=[pl.BlockSpec((tile, cols), lambda i: (i, 0)),
                      pl.BlockSpec((tile, cols), lambda i: (i, 0))],
            out_specs=pl.BlockSpec((tile, cols), lambda i: (0, 0)),
        ),
        compiler_params=pltpu.CompilerParams(dimension_semantics=("arbitrary",)),
    )(p, g)


# ----------------------------------------------------------------------------
# HiFiGANLoss (stage 0) forward
# ----------------------------------------------------------------------------
class HiFiGANLossPallas:
    def __init__(self, win_lens, fil_lens, hop_lens, stage=0,
                 pack_width=256, max_tile_rows=512, compute_dtype=jnp.bfloat16):
        # TODO(synk): stage >= 2 path (DS/DW discriminators, BCE losses, optimizer_d)
        # is a full training step with external modules; only stage-0 forward here.
        assert stage < 2
        self.win_lens = list(win_lens)
        self.fil_lens = list(fil_lens)
        self.hop_lens = list(hop_lens)
        self.max_channels = max(self.fil_lens) // 2
        self.pack = max(pack_width, max(self.fil_lens))
        for fl in self.fil_lens:
            assert self.pack % fl == 0, "filter_length must divide the pack width"
        self.max_tile_rows = max_tile_rows
        self.compute_dtype = compute_dtype
        bases = np.stack([make_packed_stft_basis(fl, wl, self.pack)
                          for fl, wl in zip(self.fil_lens, self.win_lens)], axis=0)
        self.bases = jnp.asarray(bases).astype(compute_dtype)   # (n_res, pack, pack)
        self._loss_jit = jax.jit(self._loss)

    def _loss(self, pred_audio, gt_audio):
        B, T = pred_audio.shape
        pack = self.pack
        cdt = self.compute_dtype

        # Static bookkeeping mirroring MultiResSpect.get_mel (min_CT trimming).
        n_frames = [(T + 2 * (fl // 2) - fl) // hop + 1
                    for fl, hop in zip(self.fil_lens, self.hop_lens)]
        min_CT = min((fl // 2) * nf for fl, nf in zip(self.fil_lens, n_frames))
        min_CT = min_CT // self.max_channels * self.max_channels
        kepts = [min_CT // (fl // 2) for fl in self.fil_lens]
        total_elems = sum(B * (fl // 2) * k for fl, k in zip(self.fil_lens, kepts))

        # Frame + lane-pack each resolution (pred & gt identically, slice-based framing,
        # bf16 so all prep copies are half-width).
        pred_rows, gt_rows, res_rows = [], [], []
        for fl, hop, kept in zip(self.fil_lens, self.hop_lens, kepts):
            pred_rows.append(_frames_to_rows(pred_audio, fl, hop, kept, pack, cdt))
            gt_rows.append(_frames_to_rows(gt_audio, fl, hop, kept, pack, cdt))
            res_rows.append(pred_rows[-1].shape[0])

        # Row-tile: cap at 512 and shrink until the smallest resolution spans several
        # tiles, so per-resolution tile padding waste stays small (step overhead ~0.35us).
        tile = min(self.max_tile_rows, 512)
        smallest = max(8, min(res_rows))
        while tile > 8 and 4 * tile > smallest:
            tile //= 2

        # Pad each resolution to a tile multiple so tiles never straddle resolutions
        # (padded rows contribute exactly 0 to the L1 partial sums).
        pred_blocks, gt_blocks, res_ids = [], [], []
        for ridx, (pr, gr, nr) in enumerate(zip(pred_rows, gt_rows, res_rows)):
            nr_p = _round_up(nr, tile)
            if nr_p != nr:
                pr = jnp.pad(pr, ((0, nr_p - nr), (0, 0)))
                gr = jnp.pad(gr, ((0, nr_p - nr), (0, 0)))
            nt = nr_p // tile
            pred_blocks.append(pr.reshape(nt, tile, pack))
            gt_blocks.append(gr.reshape(nt, tile, pack))
            res_ids += [ridx] * nt
        pred_all = jnp.concatenate(pred_blocks, axis=0)   # (n_tiles, tile, pack) bf16
        gt_all = jnp.concatenate(gt_blocks, axis=0)       # (n_tiles, tile, pack) bf16
        n_tiles = pred_all.shape[0]

        # Split tiles across (up to) two TensorCores via a leading "parallel" axis.
        splits = 2 if n_tiles >= 2 else 1
        tps = (n_tiles + splits - 1) // splits
        pad_tiles = splits * tps - n_tiles
        if pad_tiles:
            pred_all = jnp.pad(pred_all, ((0, pad_tiles), (0, 0), (0, 0)))
            gt_all = jnp.pad(gt_all, ((0, pad_tiles), (0, 0), (0, 0)))
            res_ids += [0] * pad_tiles
        res_ids = jnp.asarray(np.asarray(res_ids, dtype=np.int32))

        spect_part = _spect_l1_partial(res_ids, pred_all, gt_all, self.bases,
                                       splits=splits, tiles_per_split=tps,
                                       tile=tile, pack=pack)
        # F.l1_loss over the concatenated multi-res spectrogram -> single mean.
        spect_l1 = jnp.sum(spect_part) / jnp.float32(total_elems)

        audio_part = _audio_l1_partial(pred_audio, gt_audio)
        audio_l1 = jnp.sum(audio_part) / jnp.float32(B * T)
        return spect_l1 + audio_l1

    def __call__(self, pred_audio, gt_audio):
        loss = self._loss_jit(pred_audio, gt_audio)
        # TODO(synk): loss.backward(), amp scaling, grad clipping and optimizer.step()
        # are host-side training side effects, not kernel work.
        return {"train_loss": loss, "is_overflow": False}


# ----------------------------------------------------------------------------
# Demo
# ----------------------------------------------------------------------------
if __name__ == "__main__":
    key = jax.random.PRNGKey(0)
    k1, k2 = jax.random.split(key)
    B, T = 2, 512
    pred_audio = 0.1 * jax.random.normal(k1, (B, T), dtype=jnp.float32)
    gt_audio = 0.1 * jax.random.normal(k2, (B, T), dtype=jnp.float32)

    DS_config = dict(
        window_lengths=[64, 128, 32],
        filter_lengths=[64, 128, 32],
        hop_lengths=[16, 32, 8],
    )
    loss_mod = HiFiGANLossPallas(
        DS_config["window_lengths"],
        DS_config["filter_lengths"],
        DS_config["hop_lengths"],
        stage=0,
    )
    metrics = loss_mod(pred_audio, gt_audio)
    jax.block_until_ready(metrics["train_loss"])
    print("KERNEL_OK")
</pallas_src>

<mosaic_0001>
module attributes {stable_mosaic.version = 11 : i64} {
  func.func @_spect_l1_kernel(%arg0: i32, %arg1: i32, %arg2: memref<6xi32, #tpu.memory_space<smem>>, %arg3: memref<1x8x256xbf16, #tpu.memory_space<vmem>>, %arg4: memref<1x8x256xbf16, #tpu.memory_space<vmem>>, %arg5: memref<1x256x256xbf16, #tpu.memory_space<vmem>>, %arg6: memref<1x8x128xf32, #tpu.memory_space<vmem>>) attributes {dimension_semantics = [#tpu.dimension_semantics<parallel>, #tpu.dimension_semantics<arbitrary>], iteration_bounds = array<i64: 2, 3>, scalar_prefetch = 1 : i64, scratch_operands = 0 : i64, tpu.core_type = #tpu.core_type<tc>, window_params = [{transform_indices = @transform_0, window_bounds = array<i64: 1, 8, 256>}, {transform_indices = @transform_1, window_bounds = array<i64: 1, 8, 256>}, {transform_indices = @transform_2, window_bounds = array<i64: 1, 256, 256>}, {transform_indices = @transform_3, window_bounds = array<i64: 1, 8, 128>}]} {
    %c0_i32 = arith.constant 0 : i32
    %0 = arith.cmpi eq, %arg1, %c0_i32 : i32
    %1 = arith.extui %0 : i1 to i32
    %c0_i32_0 = arith.constant 0 : i32
    %2 = arith.cmpi ne, %1, %c0_i32_0 : i32
    scf.if %2 {
      %cst_19 = arith.constant 0.000000e+00 : f32
      %38 = vector.broadcast %cst_19 : f32 to vector<1x8x128xf32>
      %c0_20 = arith.constant 0 : index
      %c0_21 = arith.constant 0 : index
      %c0_22 = arith.constant 0 : index
      %39 = vector.load %arg6[%c0_20, %c0_21, %c0_22] : memref<1x8x128xf32, #tpu.memory_space<vmem>>, vector<1x8x128xf32>
      tpu.vector_store %arg6[%c0_20, %c0_21, %c0_22], %38 {strides = array<i32>} : memref<1x8x128xf32, #tpu.memory_space<vmem>>, vector<1x8x128xf32>,
    } else {
    }
    %c0 = arith.constant 0 : index
    %c0_1 = arith.constant 0 : index
    %c0_2 = arith.constant 0 : index
    %3 = vector.load %arg5[%c0, %c0_1, %c0_2] : memref<1x256x256xbf16, #tpu.memory_space<vmem>>, vector<1x256x256xbf16>
    %4 = vector.shape_cast %3 : vector<1x256x256xbf16> to vector<256x256xbf16>
    %c0_3 = arith.constant 0 : index
    %c0_4 = arith.constant 0 : index
    %c0_5 = arith.constant 0 : index
    %5 = vector.load %arg3[%c0_3, %c0_4, %c0_5] : memref<1x8x256xbf16, #tpu.memory_space<vmem>>, vector<1x8x256xbf16>
    %6 = vector.shape_cast %5 : vector<1x8x256xbf16> to vector<8x256xbf16>
    %cst = arith.constant dense<0.000000e+00> : vector<8x256xf32>
    %7 = tpu.matmul %6, %4, %cst {dimension_numbers = #tpu.dot_dimension_numbers<[1], [0], [0], [1], [0, 0, 1, 1], [], []>} : vector<8x256xbf16>, vector<256x256xbf16>, vector<8x256xf32> -> vector<8x256xf32>
    %c0_6 = arith.constant 0 : index
    %c0_7 = arith.constant 0 : index
    %c0_8 = arith.constant 0 : index
    %8 = vector.load %arg4[%c0_6, %c0_7, %c0_8] : memref<1x8x256xbf16, #tpu.memory_space<vmem>>, vector<1x8x256xbf16>
    %9 = vector.shape_cast %8 : vector<1x8x256xbf16> to vector<8x256xbf16>
    %cst_9 = arith.constant dense<0.000000e+00> : vector<8x256xf32>
    %10 = tpu.matmul %9, %4, %cst_9 {dimension_numbers = #tpu.dot_dimension_numbers<[1], [0], [0], [1], [0, 0, 1, 1], [], []>} : vector<8x256xbf16>, vector<256x256xbf16>, vector<8x256xf32> -> vector<8x256xf32>
    %11 = vector.extract_strided_slice %7 {offsets = [0, 0], sizes = [8, 128], strides = [1, 1]} : vector<8x256xf32> to vector<8x128xf32>
    %12 = vector.extract_strided_slice %7 {offsets = [0, 0], sizes = [8, 128], strides = [1, 1]} : vector<8x256xf32> to vector<8x128xf32>
    %13 = arith.mulf %11, %12 : vector<8x128xf32>
    %14 = vector.extract_strided_slice %7 {offsets = [0, 128], sizes = [8, 128], strides = [1, 1]} : vector<8x256xf32> to vector<8x128xf32>
    %15 = vector.extract_strided_slice %7 {offsets = [0, 128], sizes = [8, 128], strides = [1, 1]} : vector<8x256xf32> to vector<8x128xf32>
    %16 = arith.mulf %14, %15 : vector<8x128xf32>
    %17 = arith.addf %13, %16 : vector<8x128xf32>
    %cst_10 = arith.constant 1.000000e-10 : f32
    %18 = vector.broadcast %cst_10 : f32 to vector<8x128xf32>
    %19 = arith.maximumf %17, %18 : vector<8x128xf32>
    %20 = vector.extract_strided_slice %10 {offsets = [0, 0], sizes = [8, 128], strides = [1, 1]} : vector<8x256xf32> to vector<8x128xf32>
    %21 = vector.extract_strided_slice %10 {offsets = [0, 0], sizes = [8, 128], strides = [1, 1]} : vector<8x256xf32> to vector<8x128xf32>
    %22 = arith.mulf %20, %21 : vector<8x128xf32>
    %23 = vector.extract_strided_slice %10 {offsets = [0, 128], sizes = [8, 128], strides = [1, 1]} : vector<8x256xf32> to vector<8x128xf32>
    %24 = vector.extract_strided_slice %10 {offsets = [0, 128], sizes = [8, 128], strides = [1, 1]} : vector<8x256xf32> to vector<8x128xf32>
    %25 = arith.mulf %23, %24 : vector<8x128xf32>
    %26 = arith.addf %22, %25 : vector<8x128xf32>
    %cst_11 = arith.constant 1.000000e-10 : f32
    %27 = vector.broadcast %cst_11 : f32 to vector<8x128xf32>
    %28 = arith.maximumf %26, %27 : vector<8x128xf32>
    %29 = arith.divf %19, %28 : vector<8x128xf32>
    %30 = math.log %29 : vector<8x128xf32>
    %31 = math.absf %30 : vector<8x128xf32>
    %cst_12 = arith.constant 5.000000e-01 : f32
    %32 = vector.broadcast %cst_12 : f32 to vector<8x128xf32>
    %33 = arith.mulf %32, %31 : vector<8x128xf32>
    %c0_13 = arith.constant 0 : index
    %c0_14 = arith.constant 0 : index
    %c0_15 = arith.constant 0 : index
    %34 = vector.load %arg6[%c0_13, %c0_14, %c0_15] : memref<1x8x128xf32, #tpu.memory_space<vmem>>, vector<1x8x128xf32>
    %35 = vector.shape_cast %33 : vector<8x128xf32> to vector<1x8x128xf32>
    %36 = arith.addf %34, %35 : vector<1x8x128xf32>
    %c0_16 = arith.constant 0 : index
    %c0_17 = arith.constant 0 : index
    %c0_18 = arith.constant 0 : index
    %37 = vector.load %arg6[%c0_16, %c0_17, %c0_18] : memref<1x8x128xf32, #tpu.memory_space<vmem>>, vector<1x8x128xf32>
    tpu.vector_store %arg6[%c0_16, %c0_17, %c0_18], %36 {strides = array<i32>} : memref<1x8x128xf32, #tpu.memory_space<vmem>>, vector<1x8x128xf32>,
    return
  }
  func.func @transform_0(%arg0: i32, %arg1: i32, %arg2: memref<6xi32, #tpu.memory_space<smem>>) -> (i32, i32, i32) {
    %c3_i32 = arith.constant 3 : i32
    %0 = arith.muli %arg0, %c3_i32 : i32
    %1 = arith.addi %0, %arg1 : i32
    %c0_i32 = arith.constant 0 : i32
    %c0_i32_0 = arith.constant 0 : i32
    %c0_i32_1 = arith.constant 0 : i32
    return %1, %c0_i32, %c0_i32_0 : i32, i32, i32
  }
  func.func @transform_1(%arg0: i32, %arg1: i32, %arg2: memref<6xi32, #tpu.memory_space<smem>>) -> (i32, i32, i32) {
    %c3_i32 = arith.constant 3 : i32
    %0 = arith.muli %arg0, %c3_i32 : i32
    %1 = arith.addi %0, %arg1 : i32
    %c0_i32 = arith.constant 0 : i32
    %c0_i32_0 = arith.constant 0 : i32
    %c0_i32_1 = arith.constant 0 : i32
    return %1, %c0_i32, %c0_i32_0 : i32, i32, i32
  }
  func.func @transform_2(%arg0: i32, %arg1: i32, %arg2: memref<6xi32, #tpu.memory_space<smem>>) -> (i32, i32, i32) {
    %c3_i32 = arith.constant 3 : i32
    %0 = arith.muli %arg0, %c3_i32 : i32
    %1 = arith.addi %0, %arg1 : i32
    %2 = arith.index_cast %1 : i32 to index
    %3 = memref.load %arg2[%2] : memref<6xi32, #tpu.memory_space<smem>>
    %c0_i32 = arith.constant 0 : i32
    %c0_i32_0 = arith.constant 0 : i32
    %c0_i32_1 = arith.constant 0 : i32
    return %3, %c0_i32, %c0_i32_0 : i32, i32, i32
  }
  func.func @transform_3(%arg0: i32, %arg1: i32, %arg2: memref<6xi32, #tpu.memory_space<smem>>) -> (i32, i32, i32) {
    %c0_i32 = arith.constant 0 : i32
    %c0_i32_0 = arith.constant 0 : i32
    %c0_i32_1 = arith.constant 0 : i32
    return %arg0, %c0_i32, %c0_i32_0 : i32, i32, i32
  }
}

module attributes {stable_mosaic.version = 11 : i64} {
  func.func @_audio_l1_kernel(%arg0: i32, %arg1: memref<8x512xf32, #tpu.memory_space<vmem>>, %arg2: memref<8x512xf32, #tpu.memory_space<vmem>>, %arg3: memref<8x512xf32, #tpu.memory_space<vmem>>) attributes {dimension_semantics = [#tpu.dimension_semantics<arbitrary>], iteration_bounds = array<i64: 1>, scalar_prefetch = 0 : i64, scratch_operands = 0 : i64, tpu.core_type = #tpu.core_type<tc>, window_params = [{transform_indices = @transform_0, window_bounds = array<i64: 8, 512>}, {transform_indices = @transform_1, window_bounds = array<i64: 8, 512>}, {pipeline_mode = #tpu.pipeline_mode<synchronous>, transform_indices = @transform_2, window_bounds = array<i64: 8, 512>}]} {
    %c0_i32 = arith.constant 0 : i32
    %0 = arith.cmpi eq, %arg0, %c0_i32 : i32
    %1 = arith.extui %0 : i1 to i32
    %c0_i32_0 = arith.constant 0 : i32
    %2 = arith.cmpi ne, %1, %c0_i32_0 : i32
    scf.if %2 {
      %cst = arith.constant 0.000000e+00 : f32
      %10 = vector.broadcast %cst : f32 to vector<8x512xf32>
      %c0_8 = arith.constant 0 : index
      %c0_9 = arith.constant 0 : index
      %11 = vector.load %arg3[%c0_8, %c0_9] : memref<8x512xf32, #tpu.memory_space<vmem>>, vector<8x512xf32>
      tpu.vector_store %arg3[%c0_8, %c0_9], %10 {strides = array<i32>} : memref<8x512xf32, #tpu.memory_space<vmem>>, vector<8x512xf32>,
    } else {
    }
    %c0 = arith.constant 0 : index
    %c0_1 = arith.constant 0 : index
    %3 = vector.load %arg3[%c0, %c0_1] : memref<8x512xf32, #tpu.memory_space<vmem>>, vector<8x512xf32>
    %c0_2 = arith.constant 0 : index
    %c0_3 = arith.constant 0 : index
    %4 = vector.load %arg1[%c0_2, %c0_3] : memref<8x512xf32, #tpu.memory_space<vmem>>, vector<8x512xf32>
    %c0_4 = arith.constant 0 : index
    %c0_5 = arith.constant 0 : index
    %5 = vector.load %arg2[%c0_4, %c0_5] : memref<8x512xf32, #tpu.memory_space<vmem>>, vector<8x512xf32>
    %6 = arith.subf %4, %5 : vector<8x512xf32>
    %7 = math.absf %6 : vector<8x512xf32>
    %8 = arith.addf %3, %7 : vector<8x512xf32>
    %c0_6 = arith.constant 0 : index
    %c0_7 = arith.constant 0 : index
    %9 = vector.load %arg3[%c0_6, %c0_7] : memref<8x512xf32, #tpu.memory_space<vmem>>, vector<8x512xf32>
    tpu.vector_store %arg3[%c0_6, %c0_7], %8 {strides = array<i32>} : memref<8x512xf32, #tpu.memory_space<vmem>>, vector<8x512xf32>,
    return
  }
  func.func @transform_0(%arg0: i32) -> (i32, i32) {
    %c0_i32 = arith.constant 0 : i32
    %c0_i32_0 = arith.constant 0 : i32
    return %arg0, %c0_i32 : i32, i32
  }
  func.func @transform_1(%arg0: i32) -> (i32, i32) {
    %c0_i32 = arith.constant 0 : i32
    %c0_i32_0 = arith.constant 0 : i32
    return %arg0, %c0_i32 : i32, i32
  }
  func.func @transform_2(%arg0: i32) -> (i32, i32) {
    %c0_i32 = arith.constant 0 : i32
    %c0_i32_0 = arith.constant 0 : i32
    %c0_i32_1 = arith.constant 0 : i32
    return %c0_i32, %c0_i32_0 : i32, i32
  }
}

</mosaic_0001>

<bundles_post_ra>
// kernel: _loss.3
= control target key start
LH: loop header
LB: loop body
LE: loop exit
PB: predicated region body
PF: predicated region fallthrough
CT: control target
= control target key end

     0   :  { %s103_s0 = inlined_call_operand.vmem [shape: f32[8,512], index: 0, kind: input, shape index: {}]   ;;  %s104_s1 = inlined_call_operand.vmem [shape: f32[8,512], index: 1, kind: input, shape index: {}]   ;;  %s105_s2 = inlined_call_operand.vmem [shape: f32[8,512], index: 2, kind: output, shape index: {}]  }
   0x1   :  { %v23_v0 = vld [vmem:[%s103_s0] sm:$0xff]  ;;  %v24_v2 = vld [vmem:[%s103_s0 + $0x8] sm:$0xff]  ;;  %v25_v5 = vld [vmem:[%s103_s0 + $0x10] sm:$0xff] }
   0x2   :  { %v27_v1 = vld [vmem:[%s104_s1] sm:$0xff]  ;;  %v28_v4 = vld [vmem:[%s104_s1 + $0x8] sm:$0xff]  ;;  %v29_v6 = vld [vmem:[%s104_s1 + $0x10] sm:$0xff] }
   0x3   :  { %v31_v3 = vsub.f32 %v23_v0, %v27_v1  ;;  %v32_v7 = vsub.f32 %v24_v2, %v28_v4  ;;  %v33_v8 = vsub.f32 %v25_v5, %v29_v6  ;;  %v26_v9 = vld [vmem:[%s103_s0 + $0x18] sm:$0xff] }
   0x4   :  { %v30_v10 = vld [vmem:[%s104_s1 + $0x18] sm:$0xff] }
   0x5   :  { %v35_v11 = vand.u32 2147483647, %v31_v3  ;;  %v34_v12 = vsub.f32 %v26_v9, %v30_v10  ;;  %v36_v13 = vand.u32 2147483647, %v32_v7  ;;  %v37_v14 = vand.u32 2147483647, %v33_v8 }
   0x7   :  { %v38_v15 = vand.u32 2147483647, %v34_v12  ;;  %43 = vst [vmem:[%s105_s2] sm:$0xff] %v35_v11  ;;  %44 = vst [vmem:[%s105_s2 + $0x8] sm:$0xff] %v36_v13 }
   0x8   :  { %45 = vst [vmem:[%s105_s2 + $0x10] sm:$0xff] %v37_v14 }
   0x9   :  { %46 = vst [vmem:[%s105_s2 + $0x18] sm:$0xff] %v38_v15 }

// kernel: _loss.2
= control target key start
LH: loop header
LB: loop body
LE: loop exit
PB: predicated region body
PF: predicated region fallthrough
CT: control target
= control target key end

     0   :  { %s1031_s0 = inlined_call_operand.vmem [shape: s32[6], index: 0, kind: input, shape index: {}]   ;;  %s1032_s1 = inlined_call_operand.vmem [shape: bf16[6,8,256], index: 1, kind: input, shape index: {}]   ;;  %s1033_s2 = inlined_call_operand.vmem [shape: bf16[6,8,256], index: 2, kind: input, shape index: {}]   ;;  %s1034_s3 = inlined_call_operand.vmem [shape: bf16[3,256,256], index: 3, kind: input, shape index: {}]   ;;  %s1035_s4 = inlined_call_operand.vmem [shape: f32[2,8,128], index: 4, kind: output, shape index: {}]  }
   0x1   :  { %s9_s17 = sshll.u32 %s1031_s0, 4  ;;  %s10_s17 = int_to_ptr.vmem [resolvable:$true] %s9_s17 }
   0x2   :  { %s829_s18 = scalar_lea.vmem %s10_s17, 16  ;;  %p834_p1 = scmp.lt.s32.totalorder %s10_s17, %s10_s17 }
   0x3   :  { %p830_p0 = scmp.ne.s32.totalorder %s10_s17, %s829_s18  ;;  %p835_p2 = scmp.lt.s32.totalorder %s829_s18, %s829_s18 }
   0x5   :  { %p836_p3 = por %p835_p2, %p834_p1 }
   0x7   :  { %p837_p4 = pnand %p836_p3, %p830_p0 }
   0x9   :  { %840 = shalt.err (!%p837_p4)  }
   0xa   :  { %s883_s19 = smov [#allocation3]  }
   0xb   :  { %12 = dma.vmem_to_smem %s10_s17, 16, %s883_s19, [#allocation2] }
   0xc   :  { %861 = dma.done.wait [#allocation2], 16 }
   0xd   :  { %862 = vsyncadd [#allocation2], 4294967280 }
   0xe   :  { %14 = sfence }
   0xf   :  { %s913_s20 = smov 0   ;;  %s915_s21 = smov 0  }
  0x10   :  { %s917_s22 = smov 0   ;;  %s919_s0 = smov 0  }
  0x11   :  { %s921_s23 = smov 0  }
  0x12 LB: > { %s29_s24 = sadd.s32 1, %s873_s22  ;;  %s32_s25 = sadd.s32 1, %s877_s0  ;;  %s881_s23 = sphi %s921_s23, %s20_s23   ;;  %s877_s0 = sphi %s919_s0, %s1039_s0   ;;  %s873_s22 = sphi %s917_s22, %s1038_s22   ;;  %s869_s21 = sphi %s915_s21, %s1037_s21   ;;  %s865_s20 = sphi %s913_s20, %s1036_s20  }
  0x13   : > { %p30_p5 = scmp.ge.s32.totalorder %s29_s24, 3  ;;  %p681_p6 = scmp.ge.s32.totalorder %s881_s23, 1 }
  0x14   : > { %p204_p7 = scmp.lt.s32.totalorder %s881_s23, 7 }
  0x15   : > { %s1041_s24 = smov (%p30_p5, %s29_s24), 0  ;;  %s1043_s25 = smov (!%p30_p5, %s32_s25), %s877_s0 }
  0x16   : > { %p205_p8 = pnand %p681_p6, %p204_p7  ;;  %p34_p9 = scmp.ge.s32.totalorder %s1043_s25, 2 }
  0x17   : > { %s244_s26 = smul.u32 (!%p205_p8), 3, %s869_s21  ;;  %p273_p10 = scmp.lt.s32.totalorder (!%p205_p8), %s869_s21, 1 }
  0x18   : > { %s1045_s25 = smov (%p34_p9, %s1043_s25), 0  ;;  %208 = sbr.rel (%p205_p8) target bundleno = 345 (0x159), region = 32 }
  0x19   : > { %s245_s27 = sadd.s32 (!%p205_p8), %s865_s20, %s244_s26  ;;  %p689_p13 = scmp.ne.s32.totalorder (!%p205_p8), %s865_s20, 0 }
  0x1a   : > { %p246_p11 = scmp.lt.s32.totalorder (!%p205_p8), %s245_s27, 5  ;;  %s264_s28 = sld [smem:[#allocation3 + %s245_s27]] (!%p205_p8) }
  0x1d   : > { %s1047_s21 = smov (!%p273_p10, %s869_s21), 1  ;;  %s1049_s27 = smov (!%p246_p11, %s245_s27), 5 }
  0x1e   : > { %s688_s29 = sshll.u32 %s1047_s21, 3  ;;  %s728_s30 = sshll.u32 %s1049_s27, 3 }
  0x1f   : > { %s949_s7 = scalar_lea.vmem %s1035_s4, %s688_s29  ;;  %s954_s10 = scalar_lea.vmem %s1032_s1, %s728_s30 }
  0x20   : > { %s959_s13 = scalar_lea.vmem %s1033_s2, %s728_s30  ;;  %p265_p12 = scmp.lt.s32.totalorder %s264_s28, 2 }
  0x21   : > { %280 = sbr.rel (%p689_p13) target bundleno = 40 (0x28), region = 36 }
  0x22   : > { %s1051_s28 = smov (!%p265_p12, %s264_s28), 2 }
  0x23   : > { %s730_s14 = sshll.u32 %s1051_s28, 8 }
  0x24   : > { %s964_s17 = scalar_lea.vmem %s1034_s3, %s730_s14 }
  0x26   : > { %v884_v0 = vmov 0.0  }
  0x27   : > { %281 = vst [vmem:[%s949_s7] sm:$0xff] %v884_v0 }
  0x28 PF: > { %v773_v1 = vld [vmem:[%s964_s17 + $0x74] ss:$8 sps:$4 sm:$0xff]   ;;  %v775_v2 = vld [vmem:[%s964_s17 + $0x70] ss:$8 sps:$4 sm:$0xff]   ;;  %v776_v3 = vld [vmem:[%s964_s17 + $0x64] ss:$8 sps:$4 sm:$0xff]  }
  0x29   : > { %531 = vmatprep.subr.bf16.mxu1 %v773_v1  ;;  %482 = vmatprep.subr.bf16.mxu0 %v773_v1  ;;  %v778_v4 = vld [vmem:[%s964_s17 + $0x60] ss:$8 sps:$4 sm:$0xff]   ;;  %v779_v5 = vld [vmem:[%s964_s17 + $0x54] ss:$8 sps:$4 sm:$0xff]   ;;  %v781_v6 = vld [vmem:[%s964_s17 + $0x50] ss:$8 sps:$4 sm:$0xff]  }
  0x2a   : > { %532 = vmatpush1.bf16.msra.mxu1 %v775_v2  ;;  %483 = vmatpush1.bf16.msra.mxu0 %v775_v2  ;;  %v782_v7 = vld [vmem:[%s964_s17 + $0x44] ss:$8 sps:$4 sm:$0xff]   ;;  %v784_v8 = vld [vmem:[%s964_s17 + $0x40] ss:$8 sps:$4 sm:$0xff]   ;;  %v785_v9 = vld [vmem:[%s964_s17 + $0x34] ss:$8 sps:$4 sm:$0xff]  }
  0x2b   : > { %533 = vmatprep.subr.bf16.mxu1 %v776_v3  ;;  %484 = vmatprep.subr.bf16.mxu0 %v776_v3  ;;  %v787_v10 = vld [vmem:[%s964_s17 + $0x30] ss:$8 sps:$4 sm:$0xff]   ;;  %v788_v11 = vld [vmem:[%s964_s17 + $0x24] ss:$8 sps:$4 sm:$0xff]   ;;  %v790_v12 = vld [vmem:[%s964_s17 + $0x20] ss:$8 sps:$4 sm:$0xff]  }
  0x2c   : > { %v791_v13 = vld [vmem:[%s964_s17 + $0x14] ss:$8 sps:$4 sm:$0xff]   ;;  %v982_v14 = vld [vmem:[%s959_s13] sm:$0xff]  ;;  %v793_v18 = vld [vmem:[%s964_s17 + $0x10] ss:$8 sps:$4 sm:$0xff]  }
  0x2d   : > { %v985_v15 = vld [vmem:[%s954_s10] sm:$0xff]  ;;  %v725_v16 = vcombine.high %v982_v14, %v982_v14  ;;  %v797_v21 = vld [vmem:[%s964_s17 + $0xf4] ss:$8 sps:$4 sm:$0xff]   ;;  %v799_v22 = vld [vmem:[%s964_s17 + $0xf0] ss:$8 sps:$4 sm:$0xff]   ;;  %v724_v37 = vcombine.low %v982_v14, %v982_v14 }
  0x2e   : > { %534 = vmatpush1.bf16.msra.mxu1 %v778_v4  ;;  %485 = vmatpush1.bf16.msra.mxu0 %v778_v4  ;;  %v691_v17 = vcombine.high %v985_v15, %v985_v15  ;;  %v794_v19 = vld [vmem:[%s964_s17 + $0x4] ss:$8 sps:$4 sm:$0xff]   ;;  %v796_v20 = vld [vmem:[%s964_s17] ss:$8 sps:$4 sm:$0xff]   ;;  %v803_v25 = vld [vmem:[%s964_s17 + $0xd4] ss:$8 sps:$4 sm:$0xff]   ;;  %v690_v38 = vcombine.low %v985_v15, %v985_v15 }
  0x2f   : > { %535 = vmatprep.subr.bf16.mxu1 %v779_v5  ;;  %486 = vmatprep.subr.bf16.mxu0 %v779_v5  ;;  %v800_v23 = vld [vmem:[%s964_s17 + $0xe4] ss:$8 sps:$4 sm:$0xff]   ;;  %v802_v24 = vld [vmem:[%s964_s17 + $0xe0] ss:$8 sps:$4 sm:$0xff]   ;;  %v805_v26 = vld [vmem:[%s964_s17 + $0xd0] ss:$8 sps:$4 sm:$0xff]  }
  0x30   : > { %563 = vmatprep.mubr.bf16.mxu1 %v725_v16  ;;  %514 = vmatprep.mubr.bf16.mxu0 %v691_v17  ;;  %v806_v27 = vld [vmem:[%s964_s17 + $0xc4] ss:$8 sps:$4 sm:$0xff]   ;;  %v808_v28 = vld [vmem:[%s964_s17 + $0xc0] ss:$8 sps:$4 sm:$0xff]   ;;  %v809_v29 = vld [vmem:[%s964_s17 + $0xb4] ss:$8 sps:$4 sm:$0xff]  }
  0x31   : > { %v811_v30 = vld [vmem:[%s964_s17 + $0xb0] ss:$8 sps:$4 sm:$0xff]   ;;  %v812_v31 = vld [vmem:[%s964_s17 + $0xa4] ss:$8 sps:$4 sm:$0xff]   ;;  %v814_v32 = vld [vmem:[%s964_s17 + $0xa0] ss:$8 sps:$4 sm:$0xff]  }
  0x32   : > { %536 = vmatpush1.bf16.msra.mxu1 %v781_v6  ;;  %487 = vmatpush1.bf16.msra.mxu0 %v781_v6  ;;  %v815_v33 = vld [vmem:[%s964_s17 + $0x94] ss:$8 sps:$4 sm:$0xff]   ;;  %v817_v34 = vld [vmem:[%s964_s17 + $0x90] ss:$8 sps:$4 sm:$0xff]   ;;  %v818_v35 = vld [vmem:[%s964_s17 + $0x84] ss:$8 sps:$4 sm:$0xff]  }
  0x33   : > { %537 = vmatprep.subr.bf16.mxu1 %v782_v7  ;;  %488 = vmatprep.subr.bf16.mxu0 %v782_v7  ;;  %v820_v36 = vld [vmem:[%s964_s17 + $0x80] ss:$8 sps:$4 sm:$0xff]  }
  0x34   : > { %v586_v60 = vld [vmem:[%s949_s7] sm:$0xff] }
  0x36   : > { %538 = vmatpush1.bf16.msra.mxu1 %v784_v8  ;;  %489 = vmatpush1.bf16.msra.mxu0 %v784_v8 }
  0x37   : > { %539 = vmatprep.subr.bf16.mxu1 %v785_v9  ;;  %490 = vmatprep.subr.bf16.mxu0 %v785_v9 }
  0x3a   : > { %540 = vmatpush1.bf16.msra.mxu1 %v787_v10  ;;  %491 = vmatpush1.bf16.msra.mxu0 %v787_v10 }
  0x3b   : > { %541 = vmatprep.subr.bf16.mxu1 %v788_v11  ;;  %492 = vmatprep.subr.bf16.mxu0 %v788_v11 }
  0x3e   : > { %542 = vmatpush1.bf16.msra.mxu1 %v790_v12  ;;  %493 = vmatpush1.bf16.msra.mxu0 %v790_v12 }
  0x3f   : > { %543 = vmatprep.subr.bf16.mxu1 %v791_v13  ;;  %494 = vmatprep.subr.bf16.mxu0 %v791_v13 }
  0x42   : > { %544 = vmatpush1.bf16.msra.mxu1 %v793_v18  ;;  %495 = vmatpush1.bf16.msra.mxu0 %v793_v18 }
  0x43   : > { %545 = vmatprep.subr.bf16.mxu1 %v794_v19  ;;  %496 = vmatprep.subr.bf16.mxu0 %v794_v19 }
  0x46   : > { %546 = vmatpush1.bf16.msra.mxu1 %v796_v20  ;;  %497 = vmatpush1.bf16.msra.mxu0 %v796_v20 }
  0x47   : > { %547 = vmatprep.subr.bf16.mxu1 %v797_v21  ;;  %498 = vmatprep.subr.bf16.mxu0 %v797_v21 }
  0x4a   : > { %548 = vmatpush2.bf16.msra.mxu1 %v799_v22  ;;  %499 = vmatpush2.bf16.msra.mxu0 %v799_v22 }
  0x4b   : > { %549 = vmatprep.subr.bf16.mxu1 %v800_v23  ;;  %500 = vmatprep.subr.bf16.mxu0 %v800_v23 }
  0x4e   : > { %550 = vmatpush2.bf16.msra.mxu1 %v802_v24  ;;  %501 = vmatpush2.bf16.msra.mxu0 %v802_v24 }
  0x4f   : > { %551 = vmatprep.subr.bf16.mxu1 %v803_v25  ;;  %502 = vmatprep.subr.bf16.mxu0 %v803_v25 }
  0x52   : > { %552 = vmatpush2.bf16.msra.mxu1 %v805_v26  ;;  %503 = vmatpush2.bf16.msra.mxu0 %v805_v26 }
  0x53   : > { %553 = vmatprep.subr.bf16.mxu1 %v806_v27  ;;  %504 = vmatprep.subr.bf16.mxu0 %v806_v27 }
  0x56   : > { %554 = vmatpush2.bf16.msra.mxu1 %v808_v28  ;;  %505 = vmatpush2.bf16.msra.mxu0 %v808_v28 }
  0x57   : > { %555 = vmatprep.subr.bf16.mxu1 %v809_v29  ;;  %506 = vmatprep.subr.bf16.mxu0 %v809_v29 }
  0x5a   : > { %556 = vmatpush2.bf16.msra.mxu1 %v811_v30  ;;  %507 = vmatpush2.bf16.msra.mxu0 %v811_v30 }
  0x5b   : > { %557 = vmatprep.subr.bf16.mxu1 %v812_v31  ;;  %508 = vmatprep.subr.bf16.mxu0 %v812_v31 }
  0x5e   : > { %558 = vmatpush2.bf16.msra.mxu1 %v814_v32  ;;  %509 = vmatpush2.bf16.msra.mxu0 %v814_v32 }
  0x5f   : > { %559 = vmatprep.subr.bf16.mxu1 %v815_v33  ;;  %510 = vmatprep.subr.bf16.mxu0 %v815_v33 }
  0x62   : > { %560 = vmatpush2.bf16.msra.mxu1 %v817_v34  ;;  %511 = vmatpush2.bf16.msra.mxu0 %v817_v34 }
  0x63   : > { %561 = vmatprep.subr.bf16.mxu1 %v818_v35  ;;  %512 = vmatprep.subr.bf16.mxu0 %v818_v35 }
  0x66   : > { %562 = vmatpush2.bf16.msra.mxu1 %v820_v36  ;;  %513 = vmatpush2.bf16.msra.mxu0 %v820_v36 }
  0x69   : > { %564 = vmatmul.mubr.bf16.vlgmr.msra.gmra.mxu1 %v724_v37  ;;  %515 = vmatmul.mubr.bf16.vlgmr.msra.gmra.mxu0 %v690_v38 }
 0x129   : > { %v565_v39 = vpop.f32.mrf.mxu1  ;;  %v516_v40 = vpop.f32.mrf.mxu0 }
 0x12a   : > { %v576_v43 = vmul.f32 %v565_v39, %v565_v39  ;;  %v572_v51 = vmul.f32 %v516_v40, %v516_v40 }
 0x12b   : > { %v567_v41 = vpop.f32.mrf.mxu1  ;;  %v518_v42 = vpop.f32.mrf.mxu0 }
 0x12c   : > { %v577_v44 = vmul.f32 %v567_v41, %v567_v41  ;;  %v573_v52 = vmul.f32 %v518_v42, %v518_v42 }
 0x12d   : > { %v569_v45 = vpop.f32.mrf.mxu1  ;;  %v520_v46 = vpop.f32.mrf.mxu0 }
 0x12e   : > { %v578_v47 = vadd.f32 %v577_v44, %v576_v43  ;;  %v574_v53 = vadd.f32 %v573_v52, %v572_v51 }
 0x12f   : > { %v570_v48 = vpop.f32.mrf.mxu1  ;;  %v521_v49 = vpop.f32.mrf.mxu0 }
 0x130   : > { %v579_v50 = vmax.f32 %v578_v47, 1e-10  ;;  %v575_v54 = vmax.f32 %v574_v53, 1e-10 }
 0x132   : > { %825 = vrcp.f32 %v579_v50 }
 0x13f   : > { %v826_v55 = vpop.eup %825 }
 0x140   : > { %v581_v56 = vmul.f32 %v826_v55, %v575_v54 }
 0x142   : > { %827 = vlog2.f32 %v581_v56 }
 0x14f   : > { %v828_v57 = vpop.eup %827 }
 0x150   : > { %v583_v58 = vmul.f32 0.6931472, %v828_v57 }
 0x152   : > { %v584_v59 = vand.u32 2147483647, %v583_v58 }
 0x154   : > { %v585_v61 = vmul.f32 0.5, %v584_v59 }
 0x156   : > { %v587_v62 = vadd.f32 %v586_v60, %v585_v61 }
 0x158   : > { %588 = vst [vmem:[%s949_s7] sm:$0xff] %v587_v62 }
 0x159 PF: > { %s20_s23 = sadd.s32 1, %s881_s23   ;;  %s1036_s20 = smov %s873_s22 }
 0x15a   : > { %p17_p0 = scmp.ge.s32.totalorder %s20_s23, 8   ;;  %s1037_s21 = smov %s877_s0 }
 0x15b   : > { %s1038_s22 = smov %s1041_s24  ;;  %s1039_s0 = smov %s1045_s25 }
 0x15c   :  { %19 = sbr.rel (!%p17_p0) target bundleno = 18 (0x12), region = 72 }

</bundles_post_ra>
